<compile_context>
chip_gen: v6e
topology: v6e:2x2x1
jax: 0.10.0
libtpu: 0.0.40
codegen_flags: <defaults>
</compile_context>

<pallas_src>
import functools

import numpy as np
import jax
import jax.numpy as jnp
from jax.experimental import pallas as pl
from jax.experimental.pallas import tpu as pltpu


def _round_up(x, m):
    return ((x + m - 1) // m) * m


def _multibox_kernel(w_ref, p_lt, p_lb, p_rb, t_lt, t_lb, t_rb, out_ref,
                     *, inv_batch):
    """One grid step: 3 corners x (Dp, TR) rows -> one f32 partial."""
    w = w_ref[...]                                       # (Dp, 1) feature weights

    def corner(p_ref, t_ref):
        p = p_ref[...].astype(jnp.float32)               # (Dp, TR)
        t = t_ref[...].astype(jnp.float32)
        d = p - t
        d2 = d * d
        dp2 = d2[0:1, :]                                 # objectness, unconditional
        # int(true_p.item()) == 1 -> truncate toward zero, compare to 1.
        mask = (t[0:1, :].astype(jnp.int32) == 1).astype(jnp.float32)
        coord = jnp.sum(d2 * w, axis=0, keepdims=True)   # (1, TR) sublane reduce
        return dp2 + mask * coord                        # (1, TR)

    # Reference combination: (lt + lt + lb + rb) / batch_size  (rt dropped).
    total = (2.0 * corner(p_lt, t_lt)
             + corner(p_lb, t_lb)
             + corner(p_rb, t_rb))                       # (1, TR)
    s = jnp.sum(total) * jnp.float32(inv_batch)          # per-block partial
    out_ref[...] = jnp.broadcast_to(s, out_ref.shape)    # lane-dense full-block store


def multibox_loss(pred_lt, pred_rt, pred_lb, pred_rb,
                  true_lt, true_rt, true_lb, true_rb,
                  *, S, B, batch_size, compute_dtype=None, row_block=None):
    """Inputs are NCHW arrays of shape (N, 2*B*(23+2S), S, S)."""
    del pred_rt, true_rt          # rt has zero weight in the reference combination
    D = 23 + 2 * S

    def to_dr(x):
        # NCHW (N, 2B*D, S, S) -> (D, N*S*S*2B): features on sublanes, rows on lanes.
        x = x[:batch_size]
        if compute_dtype is not None and x.dtype != compute_dtype:
            x = x.astype(compute_dtype)                  # e.g. bf16: halve HBM bytes
        n = x.shape[0]
        x = x.reshape(n, 2 * B, D, S, S)
        x = jnp.transpose(x, (2, 0, 3, 4, 1))            # (D, N, S, S, 2B)
        return x.reshape(D, n * S * S * 2 * B)

    corners = [to_dr(v) for v in
               (pred_lt, pred_lb, pred_rb, true_lt, true_lb, true_rb)]

    R = corners[0].shape[1]
    itemsize = jnp.dtype(corners[0].dtype).itemsize
    Dp = _round_up(D, 8)

    # Row tile: ~1 MiB per input block (8192 rows f32 / 16384 rows bf16) so the
    # six double-buffered inputs stay ~12 MiB, under v5e's 16 MiB scoped VMEM
    # default, while amortizing per-grid-step overhead on v6e/v7x.
    if row_block is None:
        row_block = max(128, ((1 << 20) // (Dp * itemsize)) // 128 * 128)
    row_block = _round_up(int(row_block), 128)
    TR = min(row_block, _round_up(R, 128))
    Rp = _round_up(R, TR)
    if Dp != D or Rp != R:
        # Zero padding is numerically safe: padded rows/features give d2 == 0,
        # mask == 0 and weight == 0.
        corners = [jnp.pad(v, ((0, Dp - D), (0, Rp - R))) for v in corners]

    # Per-feature (sublane) weights, built once: p->0 (handled separately),
    # xy->1/2, q->1/20, lx/ly->1/S, padded features->0.
    w_np = np.zeros((Dp, 1), np.float32)
    w_np[1:3] = 0.5
    w_np[3:23] = 1.0 / 20.0
    w_np[23:23 + 2 * S] = 1.0 / float(S)
    w = jnp.asarray(w_np)

    G = Rp // TR
    kernel = functools.partial(_multibox_kernel,
                               inv_batch=1.0 / float(batch_size))

    in_block = pl.BlockSpec((Dp, TR), lambda r: (0, r))
    w_block = pl.BlockSpec((Dp, 1), lambda r: (0, 0))
    vmem_bytes = 2 * (6 * Dp * TR * itemsize + Dp * 4 + 8 * 128 * 4) + (2 << 20)
    vmem_bytes = max(int(vmem_bytes), 16 << 20)          # fits every generation

    out = pl.pallas_call(
        kernel,
        out_shape=jax.ShapeDtypeStruct((G, 8, 128), jnp.float32),
        grid=(G,),
        in_specs=[w_block] + [in_block] * 6,
        out_specs=pl.BlockSpec((1, 8, 128), lambda r: (r, 0, 0)),
        compiler_params=pltpu.CompilerParams(
            dimension_semantics=("parallel",),
            vmem_limit_bytes=vmem_bytes),
        cost_estimate=pl.CostEstimate(
            flops=int(15 * Dp * Rp),
            transcendentals=0,
            bytes_accessed=int(6 * Dp * Rp * itemsize + G * 8 * 128 * 4)),
    )(w, *corners)

    # Sum the per-block f32 partials outside the kernel.
    return jnp.sum(out[:, 0, 0])


def _reference_loss(pred_corners, true_corners, *, S, B, batch_size):
    """Pure-JAX reimplementation of the PyTorch forward (for verification)."""
    D = 23 + 2 * S

    def decomp(x):
        n = x.shape[0]
        return jnp.transpose(x, (0, 2, 3, 1)).reshape(n, S * S, 2 * B, D)

    def corner_loss(p, t):
        p = decomp(p).astype(jnp.float32)
        t = decomp(t).astype(jnp.float32)
        dp2 = (p[..., 0] - t[..., 0]) ** 2
        mask = (t[..., 0].astype(jnp.int32) == 1).astype(jnp.float32)
        dxy = jnp.sum((p[..., 1:3] - t[..., 1:3]) ** 2, -1) / 2.0
        dq = jnp.sum((p[..., 3:23] - t[..., 3:23]) ** 2, -1) / 20.0
        dlx = jnp.sum((p[..., 23:23 + S] - t[..., 23:23 + S]) ** 2, -1) / S
        dly = jnp.sum((p[..., 23 + S:23 + 2 * S]
                       - t[..., 23 + S:23 + 2 * S]) ** 2, -1) / S
        return jnp.sum(dp2 + mask * (dxy + dq + dlx + dly))

    l = [corner_loss(p, t) for p, t in zip(pred_corners, true_corners)]
    return (l[0] + l[0] + l[2] + l[3]) / batch_size


if __name__ == "__main__":
    def make_inputs(key, N, S, B):
        D = 23 + 2 * S
        C = 2 * B * D
        keys = jax.random.split(key, 8)
        preds = tuple(jax.random.normal(keys[i], (N, C, S, S), jnp.float32)
                      for i in range(4))
        trues = []
        for i in range(4):
            kf, kp = jax.random.split(keys[4 + i])
            feat = jax.random.normal(kf, (N, S * S, 2 * B, D), jnp.float32)
            p = jax.random.bernoulli(kp, 0.4, (N, S * S, 2 * B)).astype(jnp.float32)
            feat = feat.at[..., 0].set(p)                        # 0/1 objectness
            nchw = feat.reshape(N, S, S, 2 * B * D).transpose(0, 3, 1, 2)
            trues.append(nchw)
        return preds, tuple(trues)

    key = jax.random.PRNGKey(0)
    k1, k2 = jax.random.split(key)

    # Case 1: f32 inputs, single grid block (batch=2, S=4, B=2 -> NCHW (2,124,4,4)).
    N, S, B = 2, 4, 2
    preds, trues = make_inputs(k1, N, S, B)
    fn = jax.jit(functools.partial(multibox_loss, S=S, B=B, batch_size=N))
    loss = jax.block_until_ready(fn(*preds, *trues))
    ref = _reference_loss(preds, trues, S=S, B=B, batch_size=N)
    assert jnp.allclose(loss, ref, rtol=1e-4, atol=1e-3), (loss, ref)

    # Case 2: bf16 inputs (half the HBM stream), same kernel, f32 math inside.
    preds_bf = tuple(p.astype(jnp.bfloat16) for p in preds)
    trues_bf = tuple(t.astype(jnp.bfloat16) for t in trues)
    fn_bf = jax.jit(functools.partial(multibox_loss, S=S, B=B, batch_size=N))
    loss_bf = jax.block_until_ready(fn_bf(*preds_bf, *trues_bf))
    ref_bf = _reference_loss(preds_bf, trues_bf, S=S, B=B, batch_size=N)
    assert jnp.allclose(loss_bf, ref_bf, rtol=1e-3, atol=1e-2), (loss_bf, ref_bf)

    # Case 3: odd batch, forced multi-block grid ('parallel' per-block partials)
    # and a padded final row block.
    N3, S3, B3 = 3, 4, 2
    preds3, trues3 = make_inputs(k2, N3, S3, B3)
    fn3 = jax.jit(functools.partial(multibox_loss, S=S3, B=B3, batch_size=N3,
                                    row_block=128))
    loss3 = jax.block_until_ready(fn3(*preds3, *trues3))
    ref3 = _reference_loss(preds3, trues3, S=S3, B=B3, batch_size=N3)
    assert jnp.allclose(loss3, ref3, rtol=1e-4, atol=1e-3), (loss3, ref3)

    print("KERNEL_OK")
</pallas_src>

<mosaic_0001>
module attributes {stable_mosaic.version = 11 : i64} {
  func.func @_multibox_kernel(%arg0: i32, %arg1: memref<32x1xf32, #tpu.memory_space<vmem>>, %arg2: memref<32x128xf32, #tpu.memory_space<vmem>>, %arg3: memref<32x128xf32, #tpu.memory_space<vmem>>, %arg4: memref<32x128xf32, #tpu.memory_space<vmem>>, %arg5: memref<32x128xf32, #tpu.memory_space<vmem>>, %arg6: memref<32x128xf32, #tpu.memory_space<vmem>>, %arg7: memref<32x128xf32, #tpu.memory_space<vmem>>, %arg8: memref<1x8x128xf32, #tpu.memory_space<vmem>>) attributes {dimension_semantics = [#tpu.dimension_semantics<parallel>], iteration_bounds = array<i64: 1>, scalar_prefetch = 0 : i64, scratch_operands = 0 : i64, tpu.core_type = #tpu.core_type<tc>, window_params = [{pipeline_mode = #tpu.pipeline_mode<synchronous>, transform_indices = @transform_0, window_bounds = array<i64: 32, 1>}, {transform_indices = @transform_1, window_bounds = array<i64: 32, 128>}, {transform_indices = @transform_2, window_bounds = array<i64: 32, 128>}, {transform_indices = @transform_3, window_bounds = array<i64: 32, 128>}, {transform_indices = @transform_4, window_bounds = array<i64: 32, 128>}, {transform_indices = @transform_5, window_bounds = array<i64: 32, 128>}, {transform_indices = @transform_6, window_bounds = array<i64: 32, 128>}, {transform_indices = @transform_7, window_bounds = array<i64: 1, 8, 128>}]} {
    %c0 = arith.constant 0 : index
    %c0_0 = arith.constant 0 : index
    %0 = vector.load %arg1[%c0, %c0_0] : memref<32x1xf32, #tpu.memory_space<vmem>>, vector<32x1xf32>
    %c0_1 = arith.constant 0 : index
    %c0_2 = arith.constant 0 : index
    %1 = vector.load %arg2[%c0_1, %c0_2] : memref<32x128xf32, #tpu.memory_space<vmem>>, vector<32x128xf32>
    %c0_3 = arith.constant 0 : index
    %c0_4 = arith.constant 0 : index
    %2 = vector.load %arg5[%c0_3, %c0_4] : memref<32x128xf32, #tpu.memory_space<vmem>>, vector<32x128xf32>
    %3 = arith.subf %1, %2 : vector<32x128xf32>
    %4 = arith.mulf %3, %3 : vector<32x128xf32>
    %5 = vector.extract_strided_slice %4 {offsets = [0, 0], sizes = [1, 128], strides = [1, 1]} : vector<32x128xf32> to vector<1x128xf32>
    %6 = vector.extract_strided_slice %2 {offsets = [0, 0], sizes = [1, 128], strides = [1, 1]} : vector<32x128xf32> to vector<1x128xf32>
    %7 = arith.fptosi %6 : vector<1x128xf32> to vector<1x128xi32>
    %c1_i32 = arith.constant 1 : i32
    %8 = vector.broadcast %c1_i32 : i32 to vector<1x128xi32>
    %9 = arith.cmpi eq, %7, %8 : vector<1x128xi32>
    %10 = arith.extui %9 : vector<1x128xi1> to vector<1x128xi32>
    %11 = arith.sitofp %10 : vector<1x128xi32> to vector<1x128xf32>
    %12 = vector.broadcast %0 : vector<32x1xf32> to vector<32x128xf32>
    %13 = arith.mulf %4, %12 : vector<32x128xf32>
    %cst = arith.constant dense<0.000000e+00> : vector<128xf32>
    %14 = vector.multi_reduction <add>, %13, %cst [0] : vector<32x128xf32> to vector<128xf32>
    %15 = vector.shape_cast %14 : vector<128xf32> to vector<1x128xf32>
    %16 = arith.mulf %11, %15 : vector<1x128xf32>
    %17 = arith.addf %5, %16 : vector<1x128xf32>
    %cst_5 = arith.constant 2.000000e+00 : f32
    %18 = vector.broadcast %cst_5 : f32 to vector<1x128xf32>
    %19 = arith.mulf %18, %17 : vector<1x128xf32>
    %c0_6 = arith.constant 0 : index
    %c0_7 = arith.constant 0 : index
    %20 = vector.load %arg3[%c0_6, %c0_7] : memref<32x128xf32, #tpu.memory_space<vmem>>, vector<32x128xf32>
    %c0_8 = arith.constant 0 : index
    %c0_9 = arith.constant 0 : index
    %21 = vector.load %arg6[%c0_8, %c0_9] : memref<32x128xf32, #tpu.memory_space<vmem>>, vector<32x128xf32>
    %22 = arith.subf %20, %21 : vector<32x128xf32>
    %23 = arith.mulf %22, %22 : vector<32x128xf32>
    %24 = vector.extract_strided_slice %23 {offsets = [0, 0], sizes = [1, 128], strides = [1, 1]} : vector<32x128xf32> to vector<1x128xf32>
    %25 = vector.extract_strided_slice %21 {offsets = [0, 0], sizes = [1, 128], strides = [1, 1]} : vector<32x128xf32> to vector<1x128xf32>
    %26 = arith.fptosi %25 : vector<1x128xf32> to vector<1x128xi32>
    %c1_i32_10 = arith.constant 1 : i32
    %27 = vector.broadcast %c1_i32_10 : i32 to vector<1x128xi32>
    %28 = arith.cmpi eq, %26, %27 : vector<1x128xi32>
    %29 = arith.extui %28 : vector<1x128xi1> to vector<1x128xi32>
    %30 = arith.sitofp %29 : vector<1x128xi32> to vector<1x128xf32>
    %31 = vector.broadcast %0 : vector<32x1xf32> to vector<32x128xf32>
    %32 = arith.mulf %23, %31 : vector<32x128xf32>
    %cst_11 = arith.constant dense<0.000000e+00> : vector<128xf32>
    %33 = vector.multi_reduction <add>, %32, %cst_11 [0] : vector<32x128xf32> to vector<128xf32>
    %34 = vector.shape_cast %33 : vector<128xf32> to vector<1x128xf32>
    %35 = arith.mulf %30, %34 : vector<1x128xf32>
    %36 = arith.addf %24, %35 : vector<1x128xf32>
    %37 = arith.addf %19, %36 : vector<1x128xf32>
    %c0_12 = arith.constant 0 : index
    %c0_13 = arith.constant 0 : index
    %38 = vector.load %arg4[%c0_12, %c0_13] : memref<32x128xf32, #tpu.memory_space<vmem>>, vector<32x128xf32>
    %c0_14 = arith.constant 0 : index
    %c0_15 = arith.constant 0 : index
    %39 = vector.load %arg7[%c0_14, %c0_15] : memref<32x128xf32, #tpu.memory_space<vmem>>, vector<32x128xf32>
    %40 = arith.subf %38, %39 : vector<32x128xf32>
    %41 = arith.mulf %40, %40 : vector<32x128xf32>
    %42 = vector.extract_strided_slice %41 {offsets = [0, 0], sizes = [1, 128], strides = [1, 1]} : vector<32x128xf32> to vector<1x128xf32>
    %43 = vector.extract_strided_slice %39 {offsets = [0, 0], sizes = [1, 128], strides = [1, 1]} : vector<32x128xf32> to vector<1x128xf32>
    %44 = arith.fptosi %43 : vector<1x128xf32> to vector<1x128xi32>
    %c1_i32_16 = arith.constant 1 : i32
    %45 = vector.broadcast %c1_i32_16 : i32 to vector<1x128xi32>
    %46 = arith.cmpi eq, %44, %45 : vector<1x128xi32>
    %47 = arith.extui %46 : vector<1x128xi1> to vector<1x128xi32>
    %48 = arith.sitofp %47 : vector<1x128xi32> to vector<1x128xf32>
    %49 = vector.broadcast %0 : vector<32x1xf32> to vector<32x128xf32>
    %50 = arith.mulf %41, %49 : vector<32x128xf32>
    %cst_17 = arith.constant dense<0.000000e+00> : vector<128xf32>
    %51 = vector.multi_reduction <add>, %50, %cst_17 [0] : vector<32x128xf32> to vector<128xf32>
    %52 = vector.shape_cast %51 : vector<128xf32> to vector<1x128xf32>
    %53 = arith.mulf %48, %52 : vector<1x128xf32>
    %54 = arith.addf %42, %53 : vector<1x128xf32>
    %55 = arith.addf %37, %54 : vector<1x128xf32>
    %56 = vector.shape_cast %55 : vector<1x128xf32> to vector<1x1x128xf32>
    %cst_18 = arith.constant dense<0.000000e+00> : vector<1xf32>
    %57 = vector.multi_reduction <add>, %56, %cst_18 [1, 2] : vector<1x1x128xf32> to vector<1xf32>
    %58 = vector.shape_cast %57 : vector<1xf32> to vector<1x1x1xf32>
    %59 = vector.extract %58[0, 0, 0] : f32 from vector<1x1x1xf32>
    %cst_19 = arith.constant 5.000000e-01 : f32
    %60 = arith.mulf %59, %cst_19 : f32
    %61 = vector.broadcast %60 : f32 to vector<1x8x128xf32>
    %c0_20 = arith.constant 0 : index
    %c0_21 = arith.constant 0 : index
    %c0_22 = arith.constant 0 : index
    %62 = vector.load %arg8[%c0_20, %c0_21, %c0_22] : memref<1x8x128xf32, #tpu.memory_space<vmem>>, vector<1x8x128xf32>
    tpu.vector_store %arg8[%c0_20, %c0_21, %c0_22], %61 {strides = array<i32>} : memref<1x8x128xf32, #tpu.memory_space<vmem>>, vector<1x8x128xf32>,
    return
  }
  func.func @transform_0(%arg0: i32) -> (i32, i32) {
    %c0_i32 = arith.constant 0 : i32
    %c0_i32_0 = arith.constant 0 : i32
    %c0_i32_1 = arith.constant 0 : i32
    return %c0_i32, %c0_i32_0 : i32, i32
  }
  func.func @transform_1(%arg0: i32) -> (i32, i32) {
    %c0_i32 = arith.constant 0 : i32
    %c0_i32_0 = arith.constant 0 : i32
    return %c0_i32, %arg0 : i32, i32
  }
  func.func @transform_2(%arg0: i32) -> (i32, i32) {
    %c0_i32 = arith.constant 0 : i32
    %c0_i32_0 = arith.constant 0 : i32
    return %c0_i32, %arg0 : i32, i32
  }
  func.func @transform_3(%arg0: i32) -> (i32, i32) {
    %c0_i32 = arith.constant 0 : i32
    %c0_i32_0 = arith.constant 0 : i32
    return %c0_i32, %arg0 : i32, i32
  }
  func.func @transform_4(%arg0: i32) -> (i32, i32) {
    %c0_i32 = arith.constant 0 : i32
    %c0_i32_0 = arith.constant 0 : i32
    return %c0_i32, %arg0 : i32, i32
  }
  func.func @transform_5(%arg0: i32) -> (i32, i32) {
    %c0_i32 = arith.constant 0 : i32
    %c0_i32_0 = arith.constant 0 : i32
    return %c0_i32, %arg0 : i32, i32
  }
  func.func @transform_6(%arg0: i32) -> (i32, i32) {
    %c0_i32 = arith.constant 0 : i32
    %c0_i32_0 = arith.constant 0 : i32
    return %c0_i32, %arg0 : i32, i32
  }
  func.func @transform_7(%arg0: i32) -> (i32, i32, i32) {
    %c0_i32 = arith.constant 0 : i32
    %c0_i32_0 = arith.constant 0 : i32
    %c0_i32_1 = arith.constant 0 : i32
    return %arg0, %c0_i32, %c0_i32_0 : i32, i32, i32
  }
}

</mosaic_0001>

<bundles_post_ra>
// kernel: multibox_loss.1
= control target key start
LH: loop header
LB: loop body
LE: loop exit
PB: predicated region body
PF: predicated region fallthrough
CT: control target
= control target key end

     0   :  { %v191_v0 = vmov 0   ;;  %vm158_vm3 = vcmask 1040384   ;;  %s344_s0 = inlined_call_operand.vmem [shape: f32[32,1], index: 0, kind: input, shape index: {}]   ;;  %s345_s1 = inlined_call_operand.vmem [shape: f32[32,128], index: 1, kind: input, shape index: {}]   ;;  %s346_s4 = inlined_call_operand.vmem [shape: f32[32,128], index: 4, kind: input, shape index: {}]   ;;  %s347_s2 = inlined_call_operand.vmem [shape: f32[32,128], index: 2, kind: input, shape index: {}]   ;;  %s348_s3 = inlined_call_operand.vmem [shape: f32[32,128], index: 3, kind: input, shape index: {}]   ;;  %s349_s5 = inlined_call_operand.vmem [shape: f32[32,128], index: 5, kind: input, shape index: {}]   ;;  %s350_s6 = inlined_call_operand.vmem [shape: f32[32,128], index: 6, kind: input, shape index: {}]   ;;  %s351_s7 = inlined_call_operand.vmem [shape: f32[1,8,128], index: 7, kind: output, shape index: {}]  }
   0x1   :  { %190 = vset.pattern.permute.xlu1 %v191_v0  ;;  %189 = vset.pattern.permute.xlu0 %v191_v0  ;;  %v28_v1 = vld [vmem:[%s344_s0 + $0x10] sm:$0xff]  ;;  %v26_v2 = vld [vmem:[%s344_s0] sm:$0xff]  ;;  %v29_v3 = vld [vmem:[%s344_s0 + $0x18] sm:$0xff] }
   0x2   :  { %62 = vperm.xlu1 %190, %v28_v1   ;;  %52 = vperm.xlu0 %189, %v26_v2   ;;  %v27_v4 = vld [vmem:[%s344_s0 + $0x8] sm:$0xff]  ;;  %v30_v5 = vld [vmem:[%s345_s1] sm:$0xff]  ;;  %v32_v11 = vld [vmem:[%s345_s1 + $0x10] sm:$0xff] }
   0x3   :  { %v251_v6 = vld [vmem:[%s346_s4] sm:$0xff]  ;;  %v36_v12 = vld [vmem:[%s346_s4 + $0x10] sm:$0xff]  ;;  %v31_v13 = vld [vmem:[%s345_s1 + $0x8] sm:$0xff] }
   0x4   :  { %v86_v7 = vld [vmem:[%s347_s2] sm:$0xff]  ;;  %v35_v14 = vld [vmem:[%s346_s4 + $0x8] sm:$0xff]  ;;  %v88_v16 = vld [vmem:[%s347_s2 + $0x10] sm:$0xff]  ;;  %v38_v23 = vsub.f32 %v30_v5, %v251_v6  ;;  %v40_v35 = vsub.f32 %v32_v11, %v36_v12 }
   0x5   :  { %v259_v8 = vld [vmem:[%s349_s5] sm:$0xff]  ;;  %v87_v15 = vld [vmem:[%s347_s2 + $0x8] sm:$0xff]  ;;  %v92_v20 = vld [vmem:[%s349_s5 + $0x10] sm:$0xff]  ;;  %v39_v27 = vsub.f32 %v31_v13, %v35_v14  ;;  %v179_v14 = vtrunc.f32 %v251_v6 }
   0x6   :  { %67 = vperm.xlu1 %190, %v29_v3   ;;  %57 = vperm.xlu0 %189, %v27_v4   ;;  %v122_v9 = vld [vmem:[%s348_s3] sm:$0xff]  ;;  %v91_v17 = vld [vmem:[%s349_s5 + $0x8] sm:$0xff]  ;;  %v124_v21 = vld [vmem:[%s348_s3 + $0x10] sm:$0xff]  ;;  %v94_v28 = vsub.f32 %v86_v7, %v259_v8  ;;  %v96_v36 = vsub.f32 %v88_v16, %v92_v20  ;;  %v326_v41 = vmul.f32 %v38_v23, %v38_v23  ;;  %v181_v16 = vtrunc.f32 %v259_v8 }
   0x7   :  { %v267_v10 = vld [vmem:[%s350_s6] sm:$0xff]  ;;  %v123_v18 = vld [vmem:[%s348_s3 + $0x8] sm:$0xff]  ;;  %v128_v22 = vld [vmem:[%s350_s6 + $0x10] sm:$0xff]  ;;  %v95_v33 = vsub.f32 %v87_v15, %v91_v17  ;;  %v43_v44 = vmul.f32 %v39_v27, %v39_v27  ;;  %v44_v49 = vmul.f32 %v40_v35, %v40_v35  ;;  %v180_v23 = vcvt.f32.s32 %v179_v14 }
   0x8   :  { %v127_v19 = vld [vmem:[%s350_s6 + $0x8] sm:$0xff]  ;;  %v33_v24 = vld [vmem:[%s345_s1 + $0x18] sm:$0xff]  ;;  %v130_v29 = vsub.f32 %v122_v9, %v267_v10  ;;  %v132_v37 = vsub.f32 %v124_v21, %v128_v22  ;;  %v328_v45 = vmul.f32 %v94_v28, %v94_v28  ;;  %v100_v50 = vmul.f32 %v96_v36, %v96_v36 }
   0x9   :  { %v37_v25 = vld [vmem:[%s346_s4 + $0x18] sm:$0xff]  ;;  %v131_v34 = vsub.f32 %v123_v18, %v127_v19  ;;  %v99_v47 = vmul.f32 %v95_v33, %v95_v33  ;;  %v183_v19 = vtrunc.f32 %v267_v10  ;;  %vm47_vm0 = vcmp.eq.s32.totalorder %v180_v23, 1 }
   0xa   :  { %v89_v26 = vld [vmem:[%s347_s2 + $0x18] sm:$0xff]  ;;  %v41_v40 = vsub.f32 %v33_v24, %v37_v25  ;;  %v330_v46 = vmul.f32 %v130_v29, %v130_v29  ;;  %v136_v51 = vmul.f32 %v132_v37, %v132_v37  ;;  %v182_v25 = vcvt.f32.s32 %v181_v16 }
   0xb   :  { %v93_v30 = vld [vmem:[%s349_s5 + $0x18] sm:$0xff]  ;;  %v135_v48 = vmul.f32 %v131_v34, %v131_v34  ;;  %v184_v28 = vcvt.f32.s32 %v183_v19  ;;  %v192_v10 = vmov 0.0  }
   0xc   :  { %v125_v31 = vld [vmem:[%s348_s3 + $0x18] sm:$0xff]  ;;  %v97_v42 = vsub.f32 %v89_v26, %v93_v30  ;;  %v45_v52 = vmul.f32 %v41_v40, %v41_v40  ;;  %vm103_vm1 = vcmp.eq.s32.totalorder %v182_v25, 1  ;;  %v176_v34 = vsel %vm47_vm0, 1.0, %v192_v10 }
   0xd   :  { %v129_v32 = vld [vmem:[%s350_s6 + $0x18] sm:$0xff]  ;;  %vm139_vm2 = vcmp.eq.s32.totalorder %v184_v28, 1 }
   0xe   :  { %v133_v43 = vsub.f32 %v125_v31, %v129_v32  ;;  %v101_v55 = vmul.f32 %v97_v42, %v97_v42  ;;  %v178_v40 = vsel %vm139_vm2, 1.0, %v192_v10 }
  0x10   :  { %v137_v56 = vmul.f32 %v133_v43, %v133_v43 }
  0x7d   :  { %v63_v38 = vpop.permute.xlu1 %62  ;;  %v53_v39 = vpop.permute.xlu0 %52 }
  0x7e   :  { %v70_v54 = vmul.f32 %v53_v39, %v326_v41  ;;  %v106_v58 = vmul.f32 %v328_v45, %v53_v39  ;;  %v142_v59 = vmul.f32 %v330_v46, %v53_v39  ;;  %v72_v63 = vmul.f32 %v63_v38, %v44_v49 }
  0x7f   :  { %v108_v1 = vmul.f32 %v100_v50, %v63_v38  ;;  %v144_v2 = vmul.f32 %v136_v51, %v63_v38  ;;  %v177_v38 = vsel %vm103_vm1, 1.0, %v192_v10 }
  0x81   :  { %v58_v53 = vpop.permute.xlu0 %57  ;;  %v68_v60 = vpop.permute.xlu1 %67 }
  0x82   :  { %v71_v57 = vmul.f32 %v58_v53, %v43_v44  ;;  %v107_v61 = vmul.f32 %v99_v47, %v58_v53  ;;  %v143_v62 = vmul.f32 %v135_v48, %v58_v53  ;;  %v73_v5 = vmul.f32 %v68_v60, %v45_v52 }
  0x83   :  { %v109_v9 = vmul.f32 %v101_v55, %v68_v60  ;;  %v145_v11 = vmul.f32 %v137_v56, %v68_v60 }
  0x84   :  { %v74_v0 = vadd.f32 %v71_v57, %v70_v54  ;;  %v110_v3 = vadd.f32 %v107_v61, %v106_v58  ;;  %v146_v4 = vadd.f32 %v143_v62, %v142_v59 }
  0x86   :  { %v75_v7 = vadd.f32 %v74_v0, %v72_v63  ;;  %v111_v12 = vadd.f32 %v110_v3, %v108_v1  ;;  %v147_v13 = vadd.f32 %v146_v4, %v144_v2 }
  0x88   :  { %v76_v15 = vadd.f32 %v75_v7, %v73_v5  ;;  %v112_v17 = vadd.f32 %v111_v12, %v109_v9  ;;  %v148_v18 = vadd.f32 %v147_v13, %v145_v11 }
  0x8a   :  { %v77_v20 = vrot.slane %v76_v15, 4  ;;  %v113_v21 = vrot.slane %v112_v17, 4  ;;  %v149_v22 = vrot.slane %v148_v18, 4 }
  0x8c   :  { %v78_v24 = vadd.f32 %v77_v20, %v76_v15  ;;  %v114_v26 = vadd.f32 %v113_v21, %v112_v17  ;;  %v150_v27 = vadd.f32 %v149_v22, %v148_v18 }
  0x8e   :  { %v79_v29 = vrot.slane %v78_v24, 2  ;;  %v115_v30 = vrot.slane %v114_v26, 2  ;;  %v151_v31 = vrot.slane %v150_v27, 2 }
  0x90   :  { %v80_v6 = vadd.f32 %v79_v29, %v78_v24  ;;  %v116_v8 = vadd.f32 %v115_v30, %v114_v26  ;;  %v152_v32 = vadd.f32 %v151_v31, %v150_v27 }
  0x92   :  { %v81_v33 = vrot.slane %v80_v6, 1  ;;  %v117_v35 = vrot.slane %v116_v8, 1  ;;  %v153_v36 = vrot.slane %v152_v32, 1 }
  0x94   :  { %v82_v37 = vadd.f32 %v81_v33, %v80_v6  ;;  %v118_v39 = vadd.f32 %v117_v35, %v116_v8  ;;  %v154_v42 = vadd.f32 %v153_v36, %v152_v32 }
  0x96   :  { %v83_v43 = vmul.f32 %v176_v34, %v82_v37  ;;  %v119_v44 = vmul.f32 %v177_v38, %v118_v39  ;;  %v155_v48 = vmul.f32 %v178_v40, %v154_v42 }
  0x98   :  { %v84_v47 = vadd.f32 %v83_v43, %v326_v41  ;;  %v120_v50 = vadd.f32 %v119_v44, %v328_v45  ;;  %v156_v52 = vadd.f32 %v155_v48, %v330_v46 }
  0x9a   :  { %v85_v49 = vmul.f32 2.0, %v84_v47 }
  0x9c   :  { %v121_v51 = vadd.f32 %v120_v50, %v85_v49 }
  0x9e   :  { %v157_v53 = vadd.f32 %v156_v52, %v121_v51 }
  0xa0   :  { %v159_v54 = vsel %vm158_vm3, %v157_v53, 0.0 }
  0xa1   :  { %160 = vadd.xlane.f32.xlu0 %v159_v54 }
 0x12a   :  { %v161_v55 = vpop.xlane.xlu0 %160 }
 0x12b   :  { %v162_v56 = vrot.slane %v161_v55, 4 }
 0x12d   :  { %v163_v57 = vadd.f32 %v162_v56, %v161_v55 }
 0x12f   :  { %v164_v58 = vrot.slane %v163_v57, 2 }
 0x131   :  { %v165_v59 = vadd.f32 %v164_v58, %v163_v57 }
 0x133   :  { %v166_v60 = vrot.slane %v165_v59, 1 }
 0x135   :  { %v167_v61 = vadd.f32 %v166_v60, %v165_v59 }
 0x137   :  { %185 = vpush %v167_v61 }
 0x168   :  { %s186_s2 = spop %185 }
 0x169   :  { %s169_s3 = smul.f32 0.5, %s186_s2 }
 0x16b   :  { %v170_v41 = vstv %s169_s3 }
 0x16c   :  { %171 = vst [vmem:[%s351_s7] sm:$0xff] %v170_v41 }

</bundles_post_ra>
